<compile_context>
chip_gen: v6e
topology: v6e:2x2x1
jax: 0.10.0
libtpu: 0.0.40
codegen_flags: <defaults>
</compile_context>

<pallas_src>
import jax
import jax.numpy as jnp
import numpy as np
from jax.experimental import pallas as pl
from jax.experimental.pallas import tpu as pltpu


def _round_up(x, m):
    return (x + m - 1) // m * m


def _emb_onehot_kernel(idx_ref, sel_ref, loc_ref, tab_ref, out_ref):
    """One grid step: gather BR * P embedding rows via a one-hot MXU matmul.

    idx_ref : (BR, C)  int32 raw beta indices; column p feeds lane block p,
                       columns >= P are zero padding (ignored via sel).
    sel_ref : (C, K)   f32 selector; row p is 1.0 over lane block p (resident).
    loc_ref : (1, K)   f32 per-lane local row id, -1.0 in the K padding.
    tab_ref : (K, W)   block-diagonal packed embedding table (VMEM resident).
    out_ref : (BR, W)  lane-dense output tile (W is a multiple of 128).
    """
    idx_f = idx_ref[...].astype(jnp.float32)
    # Lane-broadcast column p of idx into its beta_dim-wide lane block on the
    # (otherwise idle) MXU instead of P compares + a logical_or tree on VPU.
    idx_bcast = jnp.dot(idx_f, sel_ref[...],
                        preferred_element_type=jnp.float32,
                        precision=jax.lax.Precision.HIGHEST)
    hot = (idx_bcast == loc_ref[...]).astype(tab_ref.dtype)
    # HIGHEST precision => one-hot @ table reproduces the f32 rows exactly.
    acc = jnp.dot(hot, tab_ref[...],
                  preferred_element_type=jnp.float32,
                  precision=jax.lax.Precision.HIGHEST)
    out_ref[...] = acc.astype(out_ref.dtype)


def pack_beta_table(emb_table):
    """Precompute the packed table + kernel constants.

    Hoist this out of the hot path (it only depends on the embedding weights)
    and pass the result to beta_embedding(..., packed=...) to avoid rebuilding
    the block-diagonal table on every call.
    """
    beta_dim, d_model = emb_table.shape
    if d_model >= 128:
        d_pad, pack = _round_up(d_model, 128), 1
    else:
        d_pad = pl.next_power_of_2(max(d_model, 1))   # divides 128
        pack = 128 // d_pad
    idx_cols = max(8, pack)                 # sublane-aligned contraction dim
    k = pack * beta_dim
    k_pad = max(128, _round_up(k, 8))       # full-lane compares, clean MXU pass
    w = pack * d_pad

    emb_p = emb_table
    if d_pad != d_model:                    # keep output lane-dense (full vst)
        emb_p = jnp.pad(emb_table, ((0, 0), (0, d_pad - d_model)))
    tab = emb_p if pack == 1 else jnp.kron(jnp.eye(pack, dtype=emb_p.dtype), emb_p)
    if k_pad != k:
        tab = jnp.pad(tab, ((0, k_pad - k), (0, 0)))

    sel = np.zeros((idx_cols, k_pad), np.float32)
    loc = np.full((1, k_pad), -1.0, np.float32)
    for p in range(pack):
        sel[p, p * beta_dim:(p + 1) * beta_dim] = 1.0
        loc[0, p * beta_dim:(p + 1) * beta_dim] = np.arange(beta_dim,
                                                            dtype=np.float32)
    return dict(tab=tab, sel=jnp.asarray(sel), loc=jnp.asarray(loc),
                pack=pack, d_pad=d_pad, idx_cols=idx_cols)


def beta_embedding(beta, emb_table, *, packed=None, block_rows=4096,
                   force_pallas=False):
    """Equivalent of torch.squeeze(nn.Embedding(beta_dim, d_model)(beta))."""
    orig_shape = beta.shape
    beta_dim, d_model = emb_table.shape

    # torch.nn.Embedding raises on out-of-range indices; we clamp (intentional).
    flat_idx = jnp.clip(beta.reshape(-1).astype(jnp.int32), 0, beta_dim - 1)
    n = flat_idx.shape[0]

    # Kilobyte-scale work: one fused XLA gather beats any pallas_call launch.
    if not force_pallas and n * d_model < (1 << 16):
        out = emb_table[flat_idx].reshape(orig_shape + (d_model,))
        return jnp.squeeze(out)

    if packed is None:
        packed = pack_beta_table(emb_table)
    tab, sel, loc = packed["tab"], packed["sel"], packed["loc"]
    pack, d_pad, idx_cols = packed["pack"], packed["d_pad"], packed["idx_cols"]
    k_pad, w = tab.shape

    rows = _round_up(n, pack * 8) // pack          # packed rows, multiple of 8
    br = min(block_rows, rows)
    # Keep >= 2 grid steps when there is enough work so both v7x TensorCores
    # get a share of the "parallel" axis (harmless no-op on v5e/v6e).
    if br >= rows and rows > 8:
        br = _round_up((rows + 1) // 2, 8)
    br = max(8, _round_up(br, 8))
    rows_padded = _round_up(rows, br)
    n_pad = rows_padded * pack

    if n_pad != n:
        flat_idx = jnp.concatenate(
            [flat_idx, jnp.zeros((n_pad - n,), jnp.int32)])
    idx2 = flat_idx.reshape(rows_padded, pack)
    if idx_cols > pack:                    # pad to a sublane-aligned width
        idx2 = jnp.pad(idx2, ((0, 0), (0, idx_cols - pack)))

    itemsize = jnp.dtype(emb_table.dtype).itemsize
    cost = pl.CostEstimate(
        flops=2 * rows_padded * k_pad * (w + idx_cols),
        transcendentals=0,
        bytes_accessed=(rows_padded * idx_cols * 4           # indices in
                        + rows_padded * w * itemsize         # output
                        + k_pad * w * itemsize               # packed table
                        + (idx_cols + 1) * k_pad * 4),       # sel + loc
    )

    out_packed = pl.pallas_call(
        _emb_onehot_kernel,
        out_shape=jax.ShapeDtypeStruct((rows_padded, w), emb_table.dtype),
        grid_spec=pltpu.PrefetchScalarGridSpec(
            num_scalar_prefetch=0,
            grid=(rows_padded // br,),
            in_specs=[
                pl.BlockSpec((br, idx_cols), lambda i: (i, 0)),
                # selector / local-lane constants / packed table stay resident
                # across the whole grid (block index never changes).
                pl.BlockSpec(sel.shape, lambda i: (0, 0)),
                pl.BlockSpec(loc.shape, lambda i: (0, 0)),
                # TODO(synk): single-buffer / pl.ANY + manual DMA once the
                # packed table grows to a few MiB (large beta_dim).
                pl.BlockSpec(tab.shape, lambda i: (0, 0)),
            ],
            out_specs=pl.BlockSpec((br, w), lambda i: (i, 0)),
        ),
        compiler_params=pltpu.CompilerParams(
            dimension_semantics=("parallel",),     # row blocks are independent
            vmem_limit_bytes=32 * 1024 * 1024,
        ),
        cost_estimate=cost,
    )(idx2, sel, loc, tab)

    out = out_packed.reshape(rows_padded * pack, d_pad)[:n, :d_model]
    out = out.reshape(orig_shape + (d_model,))
    return jnp.squeeze(out)                # torch.squeeze: drop all size-1 dims


if __name__ == "__main__":
    d_model = 32
    beta_dim = 16

    key = jax.random.PRNGKey(0)
    k_tab, k_idx1, k_idx2 = jax.random.split(key, 3)

    # nn.Embedding default init ~ N(0, 1)
    emb_table = jax.random.normal(k_tab, (beta_dim, d_model), dtype=jnp.float32)
    packed = pack_beta_table(emb_table)    # hoisted: reused across both calls

    # Test 1: beta has a trailing singleton dim so the squeeze is exercised:
    # Emb(beta) -> (2, 8, 1, d_model); squeeze -> (2, 8, d_model).
    beta1 = jax.random.randint(k_idx1, (2, 8, 1), 0, beta_dim, dtype=jnp.int32)
    out1 = jax.block_until_ready(
        beta_embedding(beta1, emb_table, packed=packed, force_pallas=True))
    ref1 = jnp.squeeze(emb_table[beta1])
    assert out1.shape == (2, 8, d_model), out1.shape
    # Precision.HIGHEST => the one-hot gather is exact; use a tight tolerance.
    assert jnp.allclose(out1, ref1, rtol=0.0, atol=1e-6), "mismatch (test 1)"

    # Test 2: multi-step grid (rows=16 -> br=8 -> 2 parallel steps).
    beta2 = jax.random.randint(k_idx2, (4, 16), 0, beta_dim, dtype=jnp.int32)
    out2 = jax.block_until_ready(
        beta_embedding(beta2, emb_table, packed=packed, force_pallas=True))
    ref2 = jnp.squeeze(emb_table[beta2])
    assert out2.shape == (4, 16, d_model), out2.shape
    assert jnp.allclose(out2, ref2, rtol=0.0, atol=1e-6), "mismatch (test 2)"

    print("KERNEL_OK")
</pallas_src>

<mosaic_0001>
module attributes {stable_mosaic.version = 11 : i64} {
  func.func @_emb_onehot_kernel(%arg0: i32, %arg1: memref<8x8xi32, #tpu.memory_space<vmem>>, %arg2: memref<8x128xf32, #tpu.memory_space<vmem>>, %arg3: memref<1x128xf32, #tpu.memory_space<vmem>>, %arg4: memref<128x128xf32, #tpu.memory_space<vmem>>, %arg5: memref<8x128xf32, #tpu.memory_space<vmem>>) attributes {dimension_semantics = [#tpu.dimension_semantics<parallel>], iteration_bounds = array<i64: 1>, scalar_prefetch = 0 : i64, scratch_operands = 0 : i64, tpu.core_type = #tpu.core_type<tc>, window_params = [{transform_indices = @transform_0, window_bounds = array<i64: 8, 8>}, {pipeline_mode = #tpu.pipeline_mode<synchronous>, transform_indices = @transform_1, window_bounds = array<i64: 8, 128>}, {pipeline_mode = #tpu.pipeline_mode<synchronous>, transform_indices = @transform_2, window_bounds = array<i64: 1, 128>}, {pipeline_mode = #tpu.pipeline_mode<synchronous>, transform_indices = @transform_3, window_bounds = array<i64: 128, 128>}, {transform_indices = @transform_4, window_bounds = array<i64: 8, 128>}]} {
    %c0 = arith.constant 0 : index
    %c0_0 = arith.constant 0 : index
    %0 = vector.load %arg1[%c0, %c0_0] : memref<8x8xi32, #tpu.memory_space<vmem>>, vector<8x8xi32>
    %1 = arith.sitofp %0 : vector<8x8xi32> to vector<8x8xf32>
    %c0_1 = arith.constant 0 : index
    %c0_2 = arith.constant 0 : index
    %2 = vector.load %arg2[%c0_1, %c0_2] : memref<8x128xf32, #tpu.memory_space<vmem>>, vector<8x128xf32>
    %cst = arith.constant dense<0.000000e+00> : vector<8x128xf32>
    %3 = tpu.matmul %1, %2, %cst {dimension_numbers = #tpu.dot_dimension_numbers<[1], [0], [0], [1], [0, 0, 1, 1], [], []>, precision = #tpu.contract_precision<fp32>} : vector<8x8xf32>, vector<8x128xf32>, vector<8x128xf32> -> vector<8x128xf32>
    %c0_3 = arith.constant 0 : index
    %c0_4 = arith.constant 0 : index
    %4 = vector.load %arg3[%c0_3, %c0_4] : memref<1x128xf32, #tpu.memory_space<vmem>>, vector<1x128xf32>
    %5 = vector.broadcast %4 : vector<1x128xf32> to vector<8x128xf32>
    %6 = arith.cmpf oeq, %3, %5 : vector<8x128xf32>
    %7 = arith.extui %6 : vector<8x128xi1> to vector<8x128xi32>
    %8 = arith.sitofp %7 : vector<8x128xi32> to vector<8x128xf32>
    %c0_5 = arith.constant 0 : index
    %c0_6 = arith.constant 0 : index
    %9 = vector.load %arg4[%c0_5, %c0_6] : memref<128x128xf32, #tpu.memory_space<vmem>>, vector<128x128xf32>
    %cst_7 = arith.constant dense<0.000000e+00> : vector<8x128xf32>
    %10 = tpu.matmul %8, %9, %cst_7 {dimension_numbers = #tpu.dot_dimension_numbers<[1], [0], [0], [1], [0, 0, 1, 1], [], []>, precision = #tpu.contract_precision<fp32>} : vector<8x128xf32>, vector<128x128xf32>, vector<8x128xf32> -> vector<8x128xf32>
    %c0_8 = arith.constant 0 : index
    %c0_9 = arith.constant 0 : index
    %11 = vector.load %arg5[%c0_8, %c0_9] : memref<8x128xf32, #tpu.memory_space<vmem>>, vector<8x128xf32>
    tpu.vector_store %arg5[%c0_8, %c0_9], %10 {strides = array<i32>} : memref<8x128xf32, #tpu.memory_space<vmem>>, vector<8x128xf32>,
    return
  }
  func.func @transform_0(%arg0: i32) -> (i32, i32) {
    %c0_i32 = arith.constant 0 : i32
    %c0_i32_0 = arith.constant 0 : i32
    return %arg0, %c0_i32 : i32, i32
  }
  func.func @transform_1(%arg0: i32) -> (i32, i32) {
    %c0_i32 = arith.constant 0 : i32
    %c0_i32_0 = arith.constant 0 : i32
    %c0_i32_1 = arith.constant 0 : i32
    return %c0_i32, %c0_i32_0 : i32, i32
  }
  func.func @transform_2(%arg0: i32) -> (i32, i32) {
    %c0_i32 = arith.constant 0 : i32
    %c0_i32_0 = arith.constant 0 : i32
    %c0_i32_1 = arith.constant 0 : i32
    return %c0_i32, %c0_i32_0 : i32, i32
  }
  func.func @transform_3(%arg0: i32) -> (i32, i32) {
    %c0_i32 = arith.constant 0 : i32
    %c0_i32_0 = arith.constant 0 : i32
    %c0_i32_1 = arith.constant 0 : i32
    return %c0_i32, %c0_i32_0 : i32, i32
  }
  func.func @transform_4(%arg0: i32) -> (i32, i32) {
    %c0_i32 = arith.constant 0 : i32
    %c0_i32_0 = arith.constant 0 : i32
    return %arg0, %c0_i32 : i32, i32
  }
}

</mosaic_0001>

<bundles_post_ra>
// kernel: tpu_custom_call.1
= control target key start
LH: loop header
LB: loop body
LE: loop exit
PB: predicated region body
PF: predicated region fallthrough
CT: control target
= control target key end

     0   :  { %9 = vsyncpa [#allocation3], 0  ;;  %s2094_s0 = inlined_call_operand.hbm [shape: s32[8,8], index: 0, kind: input, shape index: {}]   ;;  %s2095_s1 = inlined_call_operand.hbm [shape: f32[8,128], index: 1, kind: input, shape index: {}]   ;;  %s2096_s2 = inlined_call_operand.vmem [shape: f32[1,128], index: 2, kind: input, shape index: {}]   ;;  %s2097_s3 = inlined_call_operand.hbm [shape: f32[128,128], index: 3, kind: input, shape index: {}]   ;;  %s2098_s4 = inlined_call_operand.hbm [shape: f32[8,128], index: 4, kind: output, shape index: {}]  }
   0x1   :  { %10 = vsyncpa [#allocation6], 0 }
   0x2   :  { %11 = vsyncpa [#allocation4], 0  ;;  %s1646_s15 = smov [#allocation5]   ;;  %s1647_s17 = smov [#allocation2]  }
   0x3   :  { %s28_s16 = sshll.u32 %s1646_s15, 4  ;;  %s18_s18 = sshll.u32 %s1647_s17, 4  ;;  %s29_s16 = int_to_ptr.vmem [resolvable:$true] %s28_s16  ;;  %s19_s18 = int_to_ptr.vmem [resolvable:$true] %s18_s18 }
   0x4   :  { %s1568_s19 = scalar_lea.vmem %s29_s16, 128  ;;  %p1573_p1 = scmp.lt.s32.totalorder %s29_s16, %s29_s16 }
   0x5   :  { %p1569_p0 = scmp.ne.s32.totalorder %s29_s16, %s1568_s19  ;;  %p1574_p2 = scmp.lt.s32.totalorder %s1568_s19, %s1568_s19 }
   0x7   :  { %p1575_p3 = por %p1574_p2, %p1573_p1 }
   0x9   :  { %p1576_p4 = pnand %p1575_p3, %p1569_p0 }
   0xb   :  { %1579 = shalt.err (!%p1576_p4)
}
   0xc   :  { %31 = dma.hbm_to_vmem [thread:$0]  %s2095_s1, 128, %s29_s16, [#allocation6]  }
   0xd   :  { %s1588_s22 = scalar_lea.vmem %s19_s18, 128  ;;  %p1593_p6 = scmp.lt.s32.totalorder %s19_s18, %s19_s18 }
   0xe   :  { %p1589_p5 = scmp.ne.s32.totalorder %s19_s18, %s1588_s22  ;;  %p1594_p7 = scmp.lt.s32.totalorder %s1588_s22, %s1588_s22 }
  0x10   :  { %p1595_p8 = por %p1594_p7, %p1593_p6 }
  0x12   :  { %p1596_p9 = pnand %p1595_p8, %p1589_p5 }
  0x14   :  { %1599 = shalt.err (!%p1596_p9)
}
  0x15   :  { %21 = dma.hbm_to_vmem [thread:$0]  %s2094_s0, 128, %s19_s18, [#allocation3]  }
  0x16   :  { %s1648_s25 = smov [#allocation7]  }
  0x17   :  { %s39_s26 = sshll.u32 %s1648_s25, 4  ;;  %s40_s26 = int_to_ptr.vmem [resolvable:$true] %s39_s26 }
  0x18   :  { %s1608_s27 = scalar_lea.vmem %s40_s26, 2048  ;;  %p1613_p11 = scmp.lt.s32.totalorder %s40_s26, %s40_s26 }
  0x19   :  { %p1609_p10 = scmp.ne.s32.totalorder %s40_s26, %s1608_s27  ;;  %p1614_p12 = scmp.lt.s32.totalorder %s1608_s27, %s1608_s27 }
  0x1b   :  { %p1615_p13 = por %p1614_p12, %p1613_p11 }
  0x1d   :  { %p1616_p0 = pnand %p1615_p13, %p1609_p10 }
  0x1f   :  { %1619 = shalt.err (!%p1616_p0)
}
  0x20   :  { %s1649_s1 = smov 128   ;;  %s1650_s28 = smov 8  }
  0x21   :  { %45 = dma.hbm_to_vmem [thread:$0]  %s2097_s3, 2048, %s40_s26, [#allocation6], %s1649_s1, %s1649_s1, %s1650_s28  }
  0x22   :  { %1640 = dma.done.wait [#allocation3], 128  }
  0x23   :  { %1641 = vsyncadd [#allocation3], 4294967168 }
  0x24   :  { %1642 = dma.done.wait [#allocation6], 2176  }
  0x25   :  { %1643 = vsyncadd [#allocation6], 4294965120  ;;  %v1651_v0 = vmov 0.0   ;;  %vm1652_vm0 = vmmov 0   ;;  %v57_v1 = vld [vmem:[#allocation5] sm:$0xff]  ;;  %v55_v2 = vld [vmem:[#allocation2] sm:$0xff] }
  0x26   :  { %1311 = vmatprep.subr.mxu0 %v1651_v0  ;;  %1316 = vmatprep.subr.mxu1 %v1651_v0  ;;  %vm58_vm1 = vcmask 64512   ;;  %v533_v3 = vld [vmem:[#allocation7 + $0x78] sm:$0xff]  ;;  %v93_v4 = vand.u32 4294901760, %v57_v1  ;;  %v56_v5 = vcvt.s32.f32 %v55_v2  ;;  %v532_v7 = vld [vmem:[#allocation7 + $0x70] sm:$0xff]  ;;  %v531_v8 = vld [vmem:[#allocation7 + $0x68] sm:$0xff] }
  0x27   :  { %1313 = vmatprep.mubr.msk.f32.mxu0 %vm1652_vm0, %v1651_v0  ;;  %1318 = vmatprep.mubr.msk.f32.mxu1 %vm1652_vm0, %v1651_v0  ;;  %v1695_v6 = vand.u32 4294901760, %v533_v3  ;;  %v1697_v11 = vand.u32 4294901760, %v532_v7  ;;  %v530_v13 = vld [vmem:[#allocation7 + $0x60] sm:$0xff]  ;;  %v1705_v16 = vand.u32 4294901760, %v531_v8  ;;  %v529_v17 = vld [vmem:[#allocation7 + $0x58] sm:$0xff]  ;;  %v528_v24 = vld [vmem:[#allocation7 + $0x50] sm:$0xff] }
  0x28   :  { %1312 = vmatpush3.msra.mxu0 %v93_v4  ;;  %v170_v9 = vsub.f32 %v57_v1, %v93_v4  ;;  %v60_v10 = vsel %vm58_vm1, %v56_v5, 0  ;;  %v1711_v21 = vand.u32 4294901760, %v530_v13  ;;  %v1713_v23 = vand.u32 4294901760, %v529_v17  ;;  %v527_v29 = vld [vmem:[#allocation7 + $0x48] sm:$0xff]  ;;  %v526_v35 = vld [vmem:[#allocation7 + $0x40] sm:$0xff]  ;;  %v525_v39 = vld [vmem:[#allocation7 + $0x38] sm:$0xff] }
  0x29   :  { %1321 = vmatprep.subr.mxu0 %v1651_v0  ;;  %v1700_v12 = vand.u32 4294901760, %v60_v10  ;;  %v1703_v15 = vsub.f32 %v533_v3, %v1695_v6  ;;  %v1709_v20 = vsub.f32 %v532_v7, %v1697_v11  ;;  %v1717_v27 = vsub.f32 %v531_v8, %v1705_v16  ;;  %v524_v7 = vld [vmem:[#allocation7 + $0x30] sm:$0xff] }
  0x2a   :  { %v171_v14 = vand.u32 4294901760, %v170_v9  ;;  %v1721_v31 = vsub.f32 %v530_v13, %v1711_v21  ;;  %v1723_v32 = vand.u32 4294901760, %v528_v24  ;;  %v1728_v34 = vsub.f32 %v529_v17, %v1713_v23  ;;  %v522_v13 = vld [vmem:[#allocation7 + $0x20] sm:$0xff] }
  0x2b   :  { %v129_v18 = vsub.f32 %v60_v10, %v1700_v12  ;;  %v628_v26 = vand.u32 4294901760, %v1703_v15  ;;  %v635_v30 = vand.u32 4294901760, %v1709_v20  ;;  %v642_v37 = vand.u32 4294901760, %v1717_v27 }
  0x2c   :  { %v172_v19 = vsub.f32 %v170_v9, %v171_v14  ;;  %v1736_v38 = vand.u32 4294901760, %v527_v29  ;;  %v649_v41 = vand.u32 4294901760, %v1721_v31  ;;  %v1746_v42 = vsub.f32 %v528_v24, %v1723_v32 }
  0x2d   :  { %v130_v22 = vand.u32 4294901760, %v129_v18  ;;  %v629_v36 = vsub.f32 %v1703_v15, %v628_v26  ;;  %v636_v40 = vsub.f32 %v1709_v20, %v635_v30  ;;  %v1748_v43 = vand.u32 4294901760, %v526_v35 }
  0x2e   :  { %v173_v25 = vand.u32 4294901760, %v172_v19  ;;  %v656_v44 = vand.u32 4294901760, %v1728_v34  ;;  %v643_v46 = vsub.f32 %v1717_v27, %v642_v37  ;;  %v1758_v47 = vsub.f32 %v527_v29, %v1736_v38  ;;  %v521_v19 = vld [vmem:[#allocation7 + $0x18] sm:$0xff]  ;;  %v520_v29 = vld [vmem:[#allocation7 + $0x10] sm:$0xff] }
  0x2f   :  { %v131_v28 = vsub.f32 %v129_v18, %v130_v22  ;;  %v630_v45 = vand.u32 4294901760, %v629_v36  ;;  %v1760_v48 = vand.u32 4294901760, %v525_v39  ;;  %v637_v49 = vand.u32 4294901760, %v636_v40 }
  0x30   :  { %1317 = vmatpush3.msra.mxu1 %v173_v25  ;;  %v650_v50 = vsub.f32 %v1721_v31, %v649_v41  ;;  %v663_v51 = vand.u32 4294901760, %v1746_v42  ;;  %v1770_v52 = vsub.f32 %v526_v35, %v1748_v43  ;;  %v644_v53 = vand.u32 4294901760, %v643_v46 }
  0x31   :  { %v132_v33 = vand.u32 4294901760, %v131_v28  ;;  %1319 = vmatmul.mubr.f32.vlgmr.msra.gmra.mxu1 %v1700_v12  ;;  %1326 = vmatprep.subr.mxu1 %v1651_v0  ;;  %v657_v54 = vsub.f32 %v1728_v34, %v656_v44  ;;  %v670_v55 = vand.u32 4294901760, %v1758_v47  ;;  %v1779_v56 = vsub.f32 %v525_v39, %v1760_v48 }
  0x32   :  { %1327 = vmatpush3.msra.mxu1 %v93_v4  ;;  %1328 = vmatprep.mubr.msk.f32.mxu1 %vm1652_vm0, %v1651_v0  ;;  %v651_v57 = vand.u32 4294901760, %v650_v50  ;;  %v664_v58 = vsub.f32 %v1746_v42, %v663_v51  ;;  %v677_v59 = vand.u32 4294901760, %v1770_v52  ;;  %v1827_v8 = vand.u32 4294901760, %v524_v7 }
  0x33   :  { %1314 = vmatmul.mubr.f32.vlgmr.msra.gmra.mxu0 %v132_v33  ;;  %1336 = vmatprep.subr.mxu1 %v1651_v0  ;;  %v658_v60 = vand.u32 4294901760, %v657_v54  ;;  %v671_v61 = vsub.f32 %v1758_v47, %v670_v55  ;;  %v684_v62 = vand.u32 4294901760, %v1779_v56  ;;  %v1851_v28 = vand.u32 4294901760, %v521_v19 }
  0x34   :  { %1322 = vmatpush3.msra.mxu0 %v170_v9  ;;  %1323 = vmatprep.mubr.msk.f32.mxu0 %vm1652_vm0, %v1651_v0  ;;  %v665_v63 = vand.u32 4294901760, %v664_v58  ;;  %v678_v1 = vsub.f32 %v1770_v52, %v677_v59  ;;  %v523_v9 = vld [vmem:[#allocation7 + $0x28] sm:$0xff]  ;;  %v1830_v10 = vsub.f32 %v524_v7, %v1827_v8  ;;  %v1863_v40 = vand.u32 4294901760, %v520_v29 }
  0x35   :  { %1331 = vmatprep.subr.mxu0 %v1651_v0  ;;  %1329 = vmatmul.mubr.f32.vlgmr.msra.gmra.mxu1 %v130_v22  ;;  %v672_v2 = vand.u32 4294901760, %v671_v61  ;;  %v685_v3 = vsub.f32 %v1779_v56, %v684_v62  ;;  %v1860_v39 = vsub.f32 %v521_v19, %v1851_v28 }
  0x36   :  { %1337 = vmatpush3.msra.mxu1 %v93_v4  ;;  %1338 = vmatprep.mubr.msk.f32.mxu1 %vm1652_vm0, %v1651_v0  ;;  %v679_v4 = vand.u32 4294901760, %v678_v1  ;;  %v1874_v54 = vsub.f32 %v520_v29, %v1863_v40 }
  0x37   :  { %1324 = vmatmul.mubr.f32.vlgmr.msra.gmra.mxu0 %v129_v18  ;;  %1376 = vmatprep.subr.mxu1 %v1651_v0  ;;  %v686_v5 = vand.u32 4294901760, %v685_v3  ;;  %v1840_v18 = vand.u32 4294901760, %v522_v13  ;;  %v712_v50 = vand.u32 4294901760, %v1860_v39 }
  0x38   :  { %1332 = vmatpush3.msra.mxu0 %v171_v14  ;;  %1333 = vmatprep.mubr.msk.f32.mxu0 %vm1652_vm0, %v1651_v0  ;;  %v691_v14 = vand.u32 4294901760, %v1830_v10  ;;  %v2101_v1 = vand.u32 4294901760, %v1874_v54 }
  0x39   :  { %1339 = vmatmul.mubr.f32.vlgmr.msra.gmra.mxu1 %v1700_v12  ;;  %1341 = vmatprep.subr.mxu0 %v1651_v0  ;;  %v1849_v25 = vsub.f32 %v522_v13, %v1840_v18 }
  0x3a   :  { %1377 = vmatpush3.msra.mxu1 %v630_v45  ;;  %1408 = vmatprep.mubr.msk.f32.mxu1 %vm1652_vm0, %v1651_v0  ;;  %v692_v22 = vsub.f32 %v1830_v10, %v691_v14  ;;  %v519_v45 = vld [vmem:[#allocation7 + $0x8] sm:$0xff] }
  0x3b   :  { %1334 = vmatmul.mubr.f32.vlgmr.msra.gmra.mxu0 %v1700_v12  ;;  %1378 = vmatprep.subr.mxu1 %v1651_v0  ;;  %v1832_v12 = vand.u32 4294901760, %v523_v9  ;;  %v705_v36 = vand.u32 4294901760, %v1849_v25 }
  0x3c   :  { %1379 = vmatpush3.msra.mxu1 %v637_v49  ;;  %1342 = vmatpush3.msra.mxu0 %v1695_v6  ;;  %v693_v33 = vand.u32 4294901760, %v692_v22 }
  0x3d   :  { %1380 = vmatprep.subr.mxu1 %v1651_v0  ;;  %1343 = vmatprep.subr.mxu0 %v1651_v0  ;;  %v1838_v17 = vsub.f32 %v523_v9, %v1832_v12  ;;  %v706_v49 = vsub.f32 %v1849_v25, %v705_v36 }
  0x3e   :  { %1381 = vmatpush3.msra.mxu1 %v644_v53  ;;  %1344 = vmatpush3.msra.mxu0 %v1697_v11  ;;  %v1870_v53 = vand.u32 4294901760, %v519_v45 }
  0x3f   :  { %1382 = vmatprep.subr.mxu1 %v1651_v0  ;;  %1345 = vmatprep.subr.mxu0 %v1651_v0  ;;  %v698_v24 = vand.u32 4294901760, %v1838_v17  ;;  %v707_v58 = vand.u32 4294901760, %v706_v49 }
  0x40   :  { %1383 = vmatpush3.msra.mxu1 %v651_v57  ;;  %1346 = vmatpush3.msra.mxu0 %v1705_v16  ;;  %v518_v57 = vld [vmem:[#allocation7] sm:$0xff]  ;;  %v1881_v61 = vsub.f32 %v519_v45, %v1870_v53 }
  0x41   :  { %1384 = vmatprep.subr.mxu1 %v1651_v0  ;;  %1347 = vmatprep.subr.mxu0 %v1651_v0  ;;  %v699_v35 = vsub.f32 %v1838_v17, %v698_v24 }
  0x42   :  { %1385 = vmatpush3.msra.mxu1 %v658_v60  ;;  %1348 = vmatpush3.msra.mxu0 %v1711_v21  ;;  %v713_v60 = vsub.f32 %v1860_v39, %v712_v50  ;;  %v2100_v3 = vand.u32 4294901760, %v1881_v61 }
  0x43   :  { %1386 = vmatprep.subr.mxu1 %v1651_v0  ;;  %1349 = vmatprep.subr.mxu0 %v1651_v0  ;;  %v700_v46 = vand.u32 4294901760, %v699_v35 }
  0x44   :  { %1387 = vmatpush3.msra.mxu1 %v665_v63  ;;  %1350 = vmatpush3.msra.mxu0 %v1713_v23  ;;  %v1883_v63 = vand.u32 4294901760, %v518_v57  ;;  %v727_v7 = vsub.f32 %v1881_v61, %v2100_v3 }
  0x45   :  { %1388 = vmatprep.subr.mxu1 %v1651_v0  ;;  %1351 = vmatprep.subr.mxu0 %v1651_v0 }
  0x46   :  { %1389 = vmatpush3.msra.mxu1 %v672_v2  ;;  %1352 = vmatpush3.msra.mxu0 %v1723_v32  ;;  %v714_v2 = vand.u32 4294901760, %v713_v60  ;;  %v728_v19 = vand.u32 4294901760, %v727_v7 }
  0x47   :  { %1390 = vmatprep.subr.mxu1 %v1651_v0  ;;  %1353 = vmatprep.subr.mxu0 %v1651_v0 }
  0x48   :  { %1391 = vmatpush3.msra.mxu1 %v679_v4  ;;  %1354 = vmatpush3.msra.mxu0 %v1736_v38  ;;  %v1891_v4 = vsub.f32 %v518_v57, %v1883_v63 }
  0x49   :  { %1392 = vmatprep.subr.mxu1 %v1651_v0  ;;  %1355 = vmatprep.subr.mxu0 %v1651_v0 }
  0x4a   :  { %1393 = vmatpush3.msra.mxu1 %v686_v5  ;;  %1356 = vmatpush3.msra.mxu0 %v1748_v43  ;;  %v720_v5 = vsub.f32 %v1874_v54, %v2101_v1  ;;  %v2099_v9 = vand.u32 4294901760, %v1891_v4 }
  0x4b   :  { %1394 = vmatprep.subr.mxu1 %v1651_v0  ;;  %1357 = vmatprep.subr.mxu0 %v1651_v0 }
  0x4c   :  { %1358 = vmatpush3.msra.mxu0 %v1760_v48  ;;  %1373 = vmatprep.mubr.msk.f32.mxu0 %vm1652_vm0, %v1651_v0  ;;  %v721_v13 = vand.u32 4294901760, %v720_v5  ;;  %v734_v22 = vsub.f32 %v1891_v4, %v2099_v9 }
  0x4d   :  { %1359 = vmatprep.subr.mxu0 %v1651_v0  ;;  %1395 = vmatpush3.msra.mxu1 %v693_v33 }
  0x4e   :  { %1360 = vmatpush3.msra.mxu0 %v1827_v8  ;;  %1396 = vmatprep.subr.mxu1 %v1651_v0  ;;  %v735_v29 = vand.u32 4294901760, %v734_v22 }
  0x4f   :  { %1361 = vmatprep.subr.mxu0 %v1651_v0  ;;  %1397 = vmatpush3.msra.mxu1 %v700_v46 }
  0x50   :  { %1362 = vmatpush3.msra.mxu0 %v1832_v12  ;;  %1398 = vmatprep.subr.mxu1 %v1651_v0 }
  0x51   :  { %1363 = vmatprep.subr.mxu0 %v1651_v0  ;;  %1399 = vmatpush3.msra.mxu1 %v707_v58 }
  0x52   :  { %1364 = vmatpush3.msra.mxu0 %v1840_v18  ;;  %1400 = vmatprep.subr.mxu1 %v1651_v0 }
  0x53   :  { %1365 = vmatprep.subr.mxu0 %v1651_v0  ;;  %1401 = vmatpush3.msra.mxu1 %v714_v2 }
  0x54   :  { %1366 = vmatpush3.msra.mxu0 %v1851_v28  ;;  %1402 = vmatprep.subr.mxu1 %v1651_v0 }
  0x55   :  { %1367 = vmatprep.subr.mxu0 %v1651_v0  ;;  %1403 = vmatpush3.msra.mxu1 %v721_v13 }
  0x56   :  { %1368 = vmatpush3.msra.mxu0 %v1863_v40  ;;  %1404 = vmatprep.subr.mxu1 %v1651_v0 }
  0x57   :  { %1369 = vmatprep.subr.mxu0 %v1651_v0  ;;  %1405 = vmatpush3.msra.mxu1 %v728_v19 }
  0x58   :  { %1370 = vmatpush3.msra.mxu0 %v1870_v53  ;;  %1406 = vmatprep.subr.mxu1 %v1651_v0 }
  0x59   :  { %1371 = vmatprep.subr.mxu0 %v1651_v0  ;;  %1407 = vmatpush3.msra.mxu1 %v735_v29  ;;  %v1914_v29 = vld [vmem:[%s2096_s2] ss:$0 sm:$0xff]  ;;  %s1654_s2 = smov [#allocation8]  }
  0x5a   :  { %1372 = vmatpush3.msra.mxu0 %v1883_v63  ;;  %1446 = vmatprep.subr.mxu1 %v1651_v0  ;;  %s1182_s5 = sshll.u32 %s1654_s2, 4  ;;  %s1183_s5 = int_to_ptr.vmem [resolvable:$true] %s1182_s5 }
  0x5b   :  { %1411 = vmatprep.subr.mxu0 %v1651_v0  ;;  %s1620_s6 = scalar_lea.vmem %s1183_s5, 128  ;;  %p1625_p2 = scmp.lt.s32.totalorder %s1183_s5, %s1183_s5 }
  0x5c   :  { %p1621_p1 = scmp.ne.s32.totalorder %s1183_s5, %s1620_s6  ;;  %p1626_p3 = scmp.lt.s32.totalorder %s1620_s6, %s1620_s6 }
  0x5e   :  { %p1627_p4 = por %p1626_p3, %p1625_p2 }
  0x60   :  { %p1628_p5 = pnand %p1627_p4, %p1621_p1 }
  0xf1   :  { %v210_v33 = vpop.f32.mrf.mxu1 }
  0xf3   :  { %v134_v35 = vpop.f32.mrf.mxu0  ;;  %v1320_v45 = vpop.f32.mrf.mxu1 }
  0xf4   :  { %v211_v57 = vadd.f32 %v210_v33, %v134_v35  ;;  %v1653_v35 = vmov 1.0  }
  0xf5   :  { %v1315_v46 = vpop.f32.mrf.mxu0  ;;  %v358_v49 = vpop.f32.mrf.mxu1 }
  0xf7   :  { %v284_v58 = vpop.f32.mrf.mxu0  ;;  %v1330_v60 = vpop.f32.mrf.mxu1 }
  0xf8   :  { %v285_v2 = vadd.f32 %v284_v58, %v211_v57 }
  0xf9   :  { %v1325_v5 = vpop.f32.mrf.mxu0  ;;  %v504_v7 = vpop.f32.mrf.mxu1 }
  0xfa   :  { %v359_v13 = vadd.f32 %v358_v49, %v285_v2 }
  0xfb   :  { %v432_v9 = vpop.f32.mrf.mxu0  ;;  %v1340_v22 = vpop.f32.mrf.mxu1 }
  0xfc   :  { %v433_v19 = vadd.f32 %v432_v9, %v359_v13 }
  0xfd   :  { %v1335_v3 = vpop.f32.mrf.mxu0 }
  0xfe   :  { %v1916_v1 = vadd.f32 %v504_v7, %v433_v19 }
 0x100   :  { %vm515_vm2 = vcmp.eq.f32.partialorder %v1916_v1, %v1914_v29 }
 0x101   :  { %v1193_v33 = vsel %vm515_vm2, 1.0, %v1651_v0  ;;  %1409 = vmatmul.mubr.msk.f32.vlgmr.msra.gmra.mxu1 %vm515_vm2, %v1653_v35 }
 0x102   :  { %v1928_v9 = vsub.f32 %v1193_v33, %v1193_v33  ;;  %1447 = vmatpush3.msra.mxu1 %v1695_v6  ;;  %1478 = vmatprep.mubr.msk.f32.mxu1 %vm1652_vm0, %v1651_v0 }
 0x103   :  { %1448 = vmatprep.subr.mxu1 %v1651_v0 }
 0x104   :  { %1449 = vmatpush3.msra.mxu1 %v1697_v11  ;;  %v617_v3 = vand.u32 4294901760, %v1928_v9 }
 0x105   :  { %1450 = vmatprep.subr.mxu1 %v1651_v0 }
 0x106   :  { %1451 = vmatpush3.msra.mxu1 %v1705_v16  ;;  %v618_v45 = vsub.f32 %v1928_v9, %v617_v3 }
 0x107   :  { %1452 = vmatprep.subr.mxu1 %v1651_v0 }
 0x108   :  { %1453 = vmatpush3.msra.mxu1 %v1711_v21  ;;  %v619_v46 = vand.u32 4294901760, %v618_v45 }
 0x109   :  { %1454 = vmatprep.subr.mxu1 %v1651_v0 }
 0x10a   :  { %1455 = vmatpush3.msra.mxu1 %v1713_v23  ;;  %1374 = vmatmul.mubr.f32.vlgmr.msra.gmra.mxu0 %v619_v46 }
 0x10b   :  { %1412 = vmatpush3.msra.mxu0 %v1703_v15  ;;  %1456 = vmatprep.subr.mxu1 %v1651_v0  ;;  %v2104_v15 = vand.u32 4294901760, %v1891_v4 }
 0x10c   :  { %1413 = vmatprep.subr.mxu0 %v1651_v0  ;;  %1457 = vmatpush3.msra.mxu1 %v1723_v32 }
 0x10d   :  { %1414 = vmatpush3.msra.mxu0 %v1709_v20  ;;  %1458 = vmatprep.subr.mxu1 %v1651_v0 }
 0x10e   :  { %1415 = vmatprep.subr.mxu0 %v1651_v0  ;;  %1459 = vmatpush3.msra.mxu1 %v1736_v38 }
 0x10f   :  { %1416 = vmatpush3.msra.mxu0 %v1717_v27  ;;  %1460 = vmatprep.subr.mxu1 %v1651_v0 }
 0x110   :  { %1417 = vmatprep.subr.mxu0 %v1651_v0  ;;  %1461 = vmatpush3.msra.mxu1 %v1748_v43 }
 0x111   :  { %1418 = vmatpush3.msra.mxu0 %v1721_v31  ;;  %1462 = vmatprep.subr.mxu1 %v1651_v0 }
 0x112   :  { %1419 = vmatprep.subr.mxu0 %v1651_v0  ;;  %1463 = vmatpush3.msra.mxu1 %v1760_v48 }
 0x113   :  { %1420 = vmatpush3.msra.mxu0 %v1728_v34  ;;  %1464 = vmatprep.subr.mxu1 %v1651_v0 }
 0x114   :  { %1421 = vmatprep.subr.mxu0 %v1651_v0  ;;  %1465 = vmatpush3.msra.mxu1 %v1827_v8 }
 0x115   :  { %1422 = vmatpush3.msra.mxu0 %v1746_v42  ;;  %1466 = vmatprep.subr.mxu1 %v1651_v0 }
 0x116   :  { %1423 = vmatprep.subr.mxu0 %v1651_v0  ;;  %1467 = vmatpush3.msra.mxu1 %v1832_v12 }
 0x117   :  { %1424 = vmatpush3.msra.mxu0 %v1758_v47  ;;  %1468 = vmatprep.subr.mxu1 %v1651_v0 }
 0x118   :  { %1425 = vmatprep.subr.mxu0 %v1651_v0  ;;  %1469 = vmatpush3.msra.mxu1 %v1840_v18 }
 0x119   :  { %1426 = vmatpush3.msra.mxu0 %v1770_v52  ;;  %1470 = vmatprep.subr.mxu1 %v1651_v0 }
 0x11a   :  { %1427 = vmatprep.subr.mxu0 %v1651_v0  ;;  %1471 = vmatpush3.msra.mxu1 %v1851_v28 }
 0x11b   :  { %1428 = vmatpush3.msra.mxu0 %v1779_v56  ;;  %1472 = vmatprep.subr.mxu1 %v1651_v0 }
 0x11c   :  { %1429 = vmatprep.subr.mxu0 %v1651_v0  ;;  %1473 = vmatpush3.msra.mxu1 %v1863_v40 }
 0x11d   :  { %1430 = vmatpush3.msra.mxu0 %v1830_v10  ;;  %1474 = vmatprep.subr.mxu1 %v1651_v0 }
 0x11e   :  { %1431 = vmatprep.subr.mxu0 %v1651_v0  ;;  %1475 = vmatpush3.msra.mxu1 %v1870_v53 }
 0x11f   :  { %1432 = vmatpush3.msra.mxu0 %v1838_v17  ;;  %1476 = vmatprep.subr.mxu1 %v1651_v0 }
 0x120   :  { %1433 = vmatprep.subr.mxu0 %v1651_v0  ;;  %1477 = vmatpush3.msra.mxu1 %v1883_v63 }
 0x121   :  { %1434 = vmatpush3.msra.mxu0 %v1849_v25  ;;  %1479 = vmatmul.mubr.f32.vlgmr.msra.gmra.mxu1 %v617_v3 }
 0x122   :  { %1516 = vmatprep.subr.mxu1 %v1651_v0  ;;  %1435 = vmatprep.subr.mxu0 %v1651_v0 }
 0x123   :  { %1517 = vmatpush3.msra.mxu1 %v1695_v6  ;;  %1436 = vmatpush3.msra.mxu0 %v1860_v39  ;;  %v2102_v6 = vand.u32 4294901760, %v1874_v54 }
 0x124   :  { %1518 = vmatprep.subr.mxu1 %v1651_v0  ;;  %1437 = vmatprep.subr.mxu0 %v1651_v0 }
 0x125   :  { %1519 = vmatpush3.msra.mxu1 %v1697_v11  ;;  %1438 = vmatpush3.msra.mxu0 %v1874_v54  ;;  %v2103_v11 = vand.u32 4294901760, %v1881_v61 }
 0x126   :  { %1520 = vmatprep.subr.mxu1 %v1651_v0  ;;  %1439 = vmatprep.subr.mxu0 %v1651_v0 }
 0x127   :  { %1521 = vmatpush3.msra.mxu1 %v1705_v16  ;;  %1440 = vmatpush3.msra.mxu0 %v1881_v61 }
 0x128   :  { %1522 = vmatprep.subr.mxu1 %v1651_v0  ;;  %1441 = vmatprep.subr.mxu0 %v1651_v0 }
 0x129   :  { %1523 = vmatpush3.msra.mxu1 %v1711_v21  ;;  %1442 = vmatpush3.msra.mxu0 %v1891_v4 }
 0x12a   :  { %1443 = vmatprep.mubr.msk.f32.mxu0 %vm1652_vm0, %v1651_v0  ;;  %1524 = vmatprep.subr.mxu1 %v1651_v0 }
 0x12b   :  { %1444 = vmatmul.mubr.f32.vlgmr.msra.gmra.mxu0 %v1928_v9  ;;  %1481 = vmatprep.subr.mxu0 %v1651_v0 }
 0x12c   :  { %1525 = vmatpush3.msra.mxu1 %v1713_v23  ;;  %1482 = vmatpush3.msra.mxu0 %v628_v26 }
 0x12d   :  { %1526 = vmatprep.subr.mxu1 %v1651_v0  ;;  %1483 = vmatprep.subr.mxu0 %v1651_v0 }
 0x12e   :  { %1527 = vmatpush3.msra.mxu1 %v1723_v32  ;;  %1484 = vmatpush3.msra.mxu0 %v635_v30 }
 0x12f   :  { %1528 = vmatprep.subr.mxu1 %v1651_v0  ;;  %1485 = vmatprep.subr.mxu0 %v1651_v0 }
 0x130   :  { %1529 = vmatpush3.msra.mxu1 %v1736_v38  ;;  %1486 = vmatpush3.msra.mxu0 %v642_v37 }
 0x131   :  { %1530 = vmatprep.subr.mxu1 %v1651_v0  ;;  %1487 = vmatprep.subr.mxu0 %v1651_v0 }
 0x132   :  { %1531 = vmatpush3.msra.mxu1 %v1748_v43  ;;  %1488 = vmatpush3.msra.mxu0 %v649_v41 }
 0x133   :  { %1532 = vmatprep.subr.mxu1 %v1651_v0  ;;  %1489 = vmatprep.subr.mxu0 %v1651_v0 }
 0x134   :  { %1533 = vmatpush3.msra.mxu1 %v1760_v48  ;;  %1490 = vmatpush3.msra.mxu0 %v656_v44 }
 0x135   :  { %1534 = vmatprep.subr.mxu1 %v1651_v0  ;;  %1491 = vmatprep.subr.mxu0 %v1651_v0 }
 0x136   :  { %1535 = vmatpush3.msra.mxu1 %v1827_v8  ;;  %1492 = vmatpush3.msra.mxu0 %v663_v51 }
 0x137   :  { %1536 = vmatprep.subr.mxu1 %v1651_v0  ;;  %1493 = vmatprep.subr.mxu0 %v1651_v0 }
 0x138   :  { %1537 = vmatpush3.msra.mxu1 %v1832_v12  ;;  %1494 = vmatpush3.msra.mxu0 %v670_v55 }
 0x139   :  { %1538 = vmatprep.subr.mxu1 %v1651_v0  ;;  %1495 = vmatprep.subr.mxu0 %v1651_v0 }
 0x13a   :  { %1539 = vmatpush3.msra.mxu1 %v1840_v18  ;;  %1496 = vmatpush3.msra.mxu0 %v677_v59 }
 0x13b   :  { %1540 = vmatprep.subr.mxu1 %v1651_v0  ;;  %1497 = vmatprep.subr.mxu0 %v1651_v0 }
 0x13c   :  { %1541 = vmatpush3.msra.mxu1 %v1851_v28  ;;  %1498 = vmatpush3.msra.mxu0 %v684_v62 }
 0x13d   :  { %1542 = vmatprep.subr.mxu1 %v1651_v0  ;;  %1499 = vmatprep.subr.mxu0 %v1651_v0 }
 0x13e   :  { %1543 = vmatpush3.msra.mxu1 %v1863_v40  ;;  %1500 = vmatpush3.msra.mxu0 %v691_v14 }
 0x13f   :  { %1544 = vmatprep.subr.mxu1 %v1651_v0  ;;  %1501 = vmatprep.subr.mxu0 %v1651_v0 }
 0x140   :  { %1545 = vmatpush3.msra.mxu1 %v1870_v53  ;;  %1502 = vmatpush3.msra.mxu0 %v698_v24 }
 0x141   :  { %1546 = vmatprep.subr.mxu1 %v1651_v0  ;;  %1503 = vmatprep.subr.mxu0 %v1651_v0 }
 0x142   :  { %1547 = vmatpush3.msra.mxu1 %v1883_v63  ;;  %1548 = vmatprep.mubr.msk.f32.mxu1 %vm1652_vm0, %v1651_v0 }
 0x143   :  { %1504 = vmatpush3.msra.mxu0 %v705_v36  ;;  %1549 = vmatmul.mubr.msk.f32.vlgmr.msra.gmra.mxu1 %vm515_vm2, %v1653_v35 }
 0x144   :  { %1505 = vmatprep.subr.mxu0 %v1651_v0  ;;  %1513 = vmatprep.mubr.msk.f32.mxu0 %vm1652_vm0, %v1651_v0 }
 0x145   :  { %1506 = vmatpush3.msra.mxu0 %v712_v50 }
 0x146   :  { %1507 = vmatprep.subr.mxu0 %v1651_v0 }
 0x147   :  { %1508 = vmatpush3.msra.mxu0 %v2102_v6 }
 0x148   :  { %1509 = vmatprep.subr.mxu0 %v1651_v0 }
 0x149   :  { %1510 = vmatpush3.msra.mxu0 %v2103_v11 }
 0x14a   :  { %1511 = vmatprep.subr.mxu0 %v1651_v0 }
 0x14b   :  { %1512 = vmatpush3.msra.mxu0 %v2104_v15 }
 0x14c   :  { %1514 = vmatmul.mubr.msk.f32.vlgmr.msra.gmra.mxu0 %vm515_vm2, %v1653_v35 }
 0x1c1   :  { %v772_v16 = vpop.f32.mrf.mxu1 }
 0x1c3   :  { %v1410_v20 = vpop.f32.mrf.mxu1 }
 0x1ca   :  { %v621_v21 = vpop.f32.mrf.mxu0 }
 0x1cb   :  { %v773_v34 = vadd.f32 %v772_v16, %v621_v21 }
 0x1cc   :  { %v1375_v23 = vpop.f32.mrf.mxu0 }
 0x1e1   :  { %v965_v26 = vpop.f32.mrf.mxu1 }
 0x1e3   :  { %v1480_v27 = vpop.f32.mrf.mxu1 }
 0x1eb   :  { %v876_v30 = vpop.f32.mrf.mxu0 }
 0x1ec   :  { %v877_v0 = vadd.f32 %v876_v30, %v773_v34 }
 0x1ed   :  { %v1445_v31 = vpop.f32.mrf.mxu0 }
 0x1ee   :  { %v966_v38 = vadd.f32 %v965_v26, %v877_v0 }
 0x203   :  { %v1171_v32 = vpop.f32.mrf.mxu1 }
 0x205   :  { %v1550_v37 = vpop.f32.mrf.mxu1 }
 0x20c   :  { %v1084_v41 = vpop.f32.mrf.mxu0 }
 0x20d   :  { %v1085_v42 = vadd.f32 %v1084_v41, %v966_v38 }
 0x20e   :  { %v1515_v43 = vpop.f32.mrf.mxu0 }
 0x20f   :  { %v1172_v44 = vadd.f32 %v1171_v32, %v1085_v42 }
 0x211   :  { %1175 = vst [vmem:[#allocation8] sm:$0xff] %v1172_v44 }
 0x212   :  { %1631 = shalt.err (!%p1628_p5)
}
 0x213   :  { %1185 = dma.vmem_to_hbm [thread:$0]  %s1183_s5, 128, %s2098_s4, [#allocation4]  }
 0x214   :  { %1644 = dma.done.wait [#allocation4], 128  }
 0x215   :  { %1645 = vsyncadd [#allocation4], 4294967168 }
 0x216   :  { %1189 = vsyncpa [#allocation3], 1 }
 0x217   :  { %1190 = vsyncpa [#allocation6], 1 }
 0x218   :  { %1191 = vsyncpa [#allocation4], 1 }

</bundles_post_ra>
